<compile_context>
chip_gen: v7x
topology: tpu7x:2x2x1
jax: 0.10.0
libtpu: 0.0.40
codegen_flags: <defaults>
</compile_context>

<pallas_src>
import jax
import jax.numpy as jnp
from jax.experimental import pallas as pl
from jax.experimental.pallas import tpu as pltpu


def _round_up(x, m):
    return ((x + m - 1) // m) * m


# -----------------------------------------------------------------------------
# Pallas kernel: one grid step == one tile of batch rows.
# -----------------------------------------------------------------------------
def _dual_embed_kernel(attrs_ref,   # (Bt, A)      activations (f32 or bf16)
                       pos_ref,     # (Bt, E)      activations (f32 or bf16)
                       waT_ref,     # (A, E_out)   pre-transposed weight slice
                       wpT_ref,     # (E, E_out)   pre-transposed weight slice
                       b_ref,       # (1, E_out)   f32 bias
                       o_ref):      # (Bt, E_out)
    acc = jnp.dot(attrs_ref[...], waT_ref[...],
                  preferred_element_type=jnp.float32)
    acc = acc + jnp.dot(pos_ref[...], wpT_ref[...],
                        preferred_element_type=jnp.float32)
    o_ref[...] = (acc + b_ref[...].astype(jnp.float32)).astype(o_ref.dtype)


# -----------------------------------------------------------------------------
# Wrapper
# -----------------------------------------------------------------------------
def user_dual_embedding_pallas(attrs, pos_enc, prepared, *, block_b=1024):
    """prepared = dict with pre-transposed weights (see prepare_params).

    block_b: target batch-tile size (rows per grid step).  Sweep 512-2048 for
    large batches; it is automatically clamped / aligned for small batches.
    """
    B, A = attrs.shape
    E = pos_enc.shape[1]

    waT = prepared["waT"]   # (A, E_out)
    wpT = prepared["wpT"]   # (E, E_out)
    b2d = prepared["b2d"]   # (1, E_out)
    E_out = waT.shape[1]

    # Tile: multiple of 8 (sublane height), no larger than the (padded) batch.
    bb = min(block_b, _round_up(B, 8))
    bb = _round_up(bb, 8)

    # Pad the batch up to a multiple of the tile instead of falling back to a
    # single whole-batch block (avoids VMEM blow-ups / lost pipelining).
    Bp = _round_up(B, bb)
    if Bp != B:
        pad = Bp - B
        attrs_p = jnp.pad(attrs, ((0, pad), (0, 0)))
        pos_p = jnp.pad(pos_enc, ((0, pad), (0, 0)))
    else:
        attrs_p, pos_p = attrs, pos_enc

    grid = (Bp // bb,)

    out_p = pl.pallas_call(
        _dual_embed_kernel,
        out_shape=jax.ShapeDtypeStruct((Bp, E_out), attrs.dtype),
        grid=grid,
        in_specs=[
            pl.BlockSpec((bb, A), lambda i: (i, 0)),        # attrs tile
            pl.BlockSpec((bb, E), lambda i: (i, 0)),        # pos_enc tile
            pl.BlockSpec((A, E_out), lambda i: (0, 0)),     # W_a^T (resident)
            pl.BlockSpec((E, E_out), lambda i: (0, 0)),     # W_p^T (resident)
            pl.BlockSpec((1, E_out), lambda i: (0, 0)),     # bias   (resident)
        ],
        out_specs=pl.BlockSpec((bb, E_out), lambda i: (i, 0)),
        compiler_params=pltpu.CompilerParams(
            dimension_semantics=("parallel",)),
    )(attrs_p, pos_p, waT, wpT, b2d)

    return out_p[:B] if Bp != B else out_p


# -----------------------------------------------------------------------------
# Parameter prep (done ONCE, not per call): split + transpose.
# Weights stay f32 for strict parity with the PyTorch reference; the op is
# HBM-bound so the f32 MXU path costs nothing here.
# -----------------------------------------------------------------------------
def prepare_params(W, b, attr_dim):
    # W: (E_out, A + E) as in nn.Linear;  y = x @ W.T + b
    waT = jnp.asarray(W[:, :attr_dim].T)                  # (A, E_out)
    wpT = jnp.asarray(W[:, attr_dim:].T)                  # (E, E_out)
    b2d = jnp.asarray(b).reshape(1, -1).astype(jnp.float32)   # (1, E_out)
    return {"waT": waT, "wpT": wpT, "b2d": b2d}


# -----------------------------------------------------------------------------
# Pure-JAX reference (mirrors the PyTorch forward).
# -----------------------------------------------------------------------------
def user_dual_embedding_ref(attrs, pos_enc, W, b):
    x = jnp.concatenate([attrs, pos_enc], axis=1)
    return x @ W.T + b


# -----------------------------------------------------------------------------
# Deterministic init matching nn.Linear defaults:
# uniform(-1/sqrt(fan_in), 1/sqrt(fan_in)) for weight and bias.
# -----------------------------------------------------------------------------
def init_linear(key, in_features, out_features):
    kw, kb = jax.random.split(key)
    bound = 1.0 / (in_features ** 0.5)
    W = jax.random.uniform(kw, (out_features, in_features), jnp.float32,
                           -bound, bound)
    b = jax.random.uniform(kb, (out_features,), jnp.float32, -bound, bound)
    return W, b


if __name__ == "__main__":
    # Small demo shapes; B deliberately NOT a multiple of 8 to exercise the
    # padding path.
    B, ATTR_DIM, EMBED_DIM = 20, 64, 128

    key = jax.random.PRNGKey(0)
    ka, kp, kw = jax.random.split(key, 3)
    attrs = jax.random.normal(ka, (B, ATTR_DIM), jnp.float32)
    pos_enc = jax.random.normal(kp, (B, EMBED_DIM), jnp.float32)

    W, b = init_linear(kw, ATTR_DIM + EMBED_DIM, EMBED_DIM)
    prepared = prepare_params(W, b, ATTR_DIM)

    out = user_dual_embedding_pallas(attrs, pos_enc, prepared)
    out = jax.block_until_ready(out)

    ref = user_dual_embedding_ref(attrs, pos_enc, W, b)
    assert out.shape == (B, EMBED_DIM)
    # f32 end-to-end; small tolerance for accumulation-order differences.
    assert jnp.allclose(out, ref, atol=2e-3, rtol=2e-3), (
        float(jnp.max(jnp.abs(out - ref))))

    print("KERNEL_OK")
</pallas_src>

<mosaic_0001>
module attributes {stable_mosaic.version = 11 : i64} {
  func.func @_dual_embed_kernel(%arg0: i32, %arg1: memref<24x64xf32, #tpu.memory_space<vmem>>, %arg2: memref<24x128xf32, #tpu.memory_space<vmem>>, %arg3: memref<64x128xf32, #tpu.memory_space<vmem>>, %arg4: memref<128x128xf32, #tpu.memory_space<vmem>>, %arg5: memref<1x128xf32, #tpu.memory_space<vmem>>, %arg6: memref<24x128xf32, #tpu.memory_space<vmem>>) attributes {dimension_semantics = [#tpu.dimension_semantics<parallel>], iteration_bounds = array<i64: 1>, scalar_prefetch = 0 : i64, scratch_operands = 0 : i64, tpu.core_type = #tpu.core_type<tc>, window_params = [{transform_indices = @transform_0, window_bounds = array<i64: 24, 64>}, {transform_indices = @transform_1, window_bounds = array<i64: 24, 128>}, {pipeline_mode = #tpu.pipeline_mode<synchronous>, transform_indices = @transform_2, window_bounds = array<i64: 64, 128>}, {pipeline_mode = #tpu.pipeline_mode<synchronous>, transform_indices = @transform_3, window_bounds = array<i64: 128, 128>}, {pipeline_mode = #tpu.pipeline_mode<synchronous>, transform_indices = @transform_4, window_bounds = array<i64: 1, 128>}, {transform_indices = @transform_5, window_bounds = array<i64: 24, 128>}]} {
    %c0 = arith.constant 0 : index
    %c0_0 = arith.constant 0 : index
    %0 = vector.load %arg1[%c0, %c0_0] : memref<24x64xf32, #tpu.memory_space<vmem>>, vector<24x64xf32>
    %c0_1 = arith.constant 0 : index
    %c0_2 = arith.constant 0 : index
    %1 = vector.load %arg3[%c0_1, %c0_2] : memref<64x128xf32, #tpu.memory_space<vmem>>, vector<64x128xf32>
    %cst = arith.constant dense<0.000000e+00> : vector<24x128xf32>
    %2 = tpu.matmul %0, %1, %cst {dimension_numbers = #tpu.dot_dimension_numbers<[1], [0], [0], [1], [0, 0, 1, 1], [], []>} : vector<24x64xf32>, vector<64x128xf32>, vector<24x128xf32> -> vector<24x128xf32>
    %c0_3 = arith.constant 0 : index
    %c0_4 = arith.constant 0 : index
    %3 = vector.load %arg2[%c0_3, %c0_4] : memref<24x128xf32, #tpu.memory_space<vmem>>, vector<24x128xf32>
    %c0_5 = arith.constant 0 : index
    %c0_6 = arith.constant 0 : index
    %4 = vector.load %arg4[%c0_5, %c0_6] : memref<128x128xf32, #tpu.memory_space<vmem>>, vector<128x128xf32>
    %cst_7 = arith.constant dense<0.000000e+00> : vector<24x128xf32>
    %5 = tpu.matmul %3, %4, %cst_7 {dimension_numbers = #tpu.dot_dimension_numbers<[1], [0], [0], [1], [0, 0, 1, 1], [], []>} : vector<24x128xf32>, vector<128x128xf32>, vector<24x128xf32> -> vector<24x128xf32>
    %6 = arith.addf %2, %5 : vector<24x128xf32>
    %c0_8 = arith.constant 0 : index
    %c0_9 = arith.constant 0 : index
    %7 = vector.load %arg5[%c0_8, %c0_9] : memref<1x128xf32, #tpu.memory_space<vmem>>, vector<1x128xf32>
    %8 = vector.broadcast %7 : vector<1x128xf32> to vector<24x128xf32>
    %9 = arith.addf %6, %8 : vector<24x128xf32>
    %c0_10 = arith.constant 0 : index
    %c0_11 = arith.constant 0 : index
    %10 = vector.load %arg6[%c0_10, %c0_11] : memref<24x128xf32, #tpu.memory_space<vmem>>, vector<24x128xf32>
    tpu.vector_store %arg6[%c0_10, %c0_11], %9 {strides = array<i32>} : memref<24x128xf32, #tpu.memory_space<vmem>>, vector<24x128xf32>,
    return
  }
  func.func @transform_0(%arg0: i32) -> (i32, i32) {
    %c0_i32 = arith.constant 0 : i32
    %c0_i32_0 = arith.constant 0 : i32
    return %arg0, %c0_i32 : i32, i32
  }
  func.func @transform_1(%arg0: i32) -> (i32, i32) {
    %c0_i32 = arith.constant 0 : i32
    %c0_i32_0 = arith.constant 0 : i32
    return %arg0, %c0_i32 : i32, i32
  }
  func.func @transform_2(%arg0: i32) -> (i32, i32) {
    %c0_i32 = arith.constant 0 : i32
    %c0_i32_0 = arith.constant 0 : i32
    %c0_i32_1 = arith.constant 0 : i32
    return %c0_i32, %c0_i32_0 : i32, i32
  }
  func.func @transform_3(%arg0: i32) -> (i32, i32) {
    %c0_i32 = arith.constant 0 : i32
    %c0_i32_0 = arith.constant 0 : i32
    %c0_i32_1 = arith.constant 0 : i32
    return %c0_i32, %c0_i32_0 : i32, i32
  }
  func.func @transform_4(%arg0: i32) -> (i32, i32) {
    %c0_i32 = arith.constant 0 : i32
    %c0_i32_0 = arith.constant 0 : i32
    %c0_i32_1 = arith.constant 0 : i32
    return %c0_i32, %c0_i32_0 : i32, i32
  }
  func.func @transform_5(%arg0: i32) -> (i32, i32) {
    %c0_i32 = arith.constant 0 : i32
    %c0_i32_0 = arith.constant 0 : i32
    return %arg0, %c0_i32 : i32, i32
  }
}

</mosaic_0001>

<bundles_post_ra>
// kernel: tpu_custom_call.1
= control target key start
LH: loop header
LB: loop body
LE: loop exit
PB: predicated region body
PF: predicated region fallthrough
CT: control target
= control target key end

     0   :  { %10 = vsyncpa [#allocation3], 0  ;;  %s731_s0 = inlined_call_operand.hbm [shape: f32[24,64], index: 0, kind: input, shape index: {}]   ;;  %s732_s1 = inlined_call_operand.hbm [shape: f32[24,128], index: 1, kind: input, shape index: {}]   ;;  %s733_s2 = inlined_call_operand.hbm [shape: f32[64,128], index: 2, kind: input, shape index: {}]   ;;  %s734_s3 = inlined_call_operand.hbm [shape: f32[128,128], index: 3, kind: input, shape index: {}]   ;;  %s735_s4 = inlined_call_operand.vmem [shape: f32[1,128], index: 4, kind: input, shape index: {}]   ;;  %s736_s5 = inlined_call_operand.hbm [shape: f32[24,128], index: 5, kind: output, shape index: {}]  }
   0x1   :  { %11 = vsyncpa [#allocation6], 0 }
   0x2   :  { %12 = vsyncpa [#allocation9], 0 }
   0x3   :  { %13 = vsyncpa [#allocation4], 0  ;;  %s572_s18 = smov [#allocation5]   ;;  %s573_s20 = smov [#allocation2]  }
   0x4   :  { %s31_s19 = sshll.u32 %s572_s18, 4  ;;  %s19_s21 = sshll.u32 %s573_s20, 4  ;;  %s32_s19 = int_to_ptr.vmem [resolvable:$true] %s31_s19  ;;  %s612_s21 = int_to_ptr.vmem [resolvable:$true] %s19_s21 }
   0x5   :  { %s454_s24 = scalar_lea.hbm %s732_s1, 384 }
   0x6   :  { %p455_p0 = scmp.ne.s32.totalorder %s732_s1, %s454_s24  ;;  %p458_p1 = scmp.lt.u32.totalorder %s454_s24, %s732_s1 }
   0x8   :  { %p460_p2 = pnand %p458_p1, %p455_p0 }
   0xa   :  { %463 = shalt.err (!%p460_p2)
}
   0xb   :  { %s464_s29 = scalar_lea.vmem %s32_s19, 384  ;;  %p469_p4 = scmp.lt.s32.totalorder %s32_s19, %s32_s19 }
   0xc   :  { %p465_p3 = scmp.ne.s32.totalorder %s32_s19, %s464_s29  ;;  %p470_p5 = scmp.lt.s32.totalorder %s464_s29, %s464_s29 }
   0xe   :  { %p471_p6 = por %p470_p5, %p469_p4 }
  0x10   :  { %p472_p7 = pnand %p471_p6, %p465_p3 }
  0x12   :  { %475 = shalt.err (!%p472_p7)
}
  0x13   :  { %s574_s30 = smov 128   ;;  %s575_s6 = smov 8  }
  0x14   :  { %37 = dma.hbm_to_vmem [thread:$0]  %s732_s1, 384, %s32_s19, [#allocation6], %s574_s30, %s574_s30, %s575_s6  }
  0x15   :  { %s476_s11 = scalar_lea.hbm %s731_s0, 384 }
  0x16   :  { %p477_p8 = scmp.ne.s32.totalorder %s731_s0, %s476_s11  ;;  %p480_p9 = scmp.lt.u32.totalorder %s476_s11, %s731_s0 }
  0x18   :  { %p482_p10 = pnand %p480_p9, %p477_p8 }
  0x1a   :  { %485 = shalt.err (!%p482_p10)
}
  0x1b   :  { %s486_s16 = scalar_lea.vmem %s612_s21, 384  ;;  %p491_p12 = scmp.lt.s32.totalorder %s612_s21, %s612_s21 }
  0x1c   :  { %p487_p11 = scmp.ne.s32.totalorder %s612_s21, %s486_s16  ;;  %p492_p13 = scmp.lt.s32.totalorder %s486_s16, %s486_s16 }
  0x1e   :  { %p493_p0 = por %p492_p13, %p491_p12 }
  0x20   :  { %p494_p1 = pnand %p493_p0, %p487_p11 }
  0x22   :  { %497 = shalt.err (!%p494_p1)
}
  0x23   :  { %25 = dma.hbm_to_vmem [thread:$0]  %s731_s0, 384, %s612_s21, [#allocation3], %s574_s30, %s574_s30, %s575_s6  }
  0x24   :  { %s576_s18 = smov [#allocation7]   ;;  %s577_s20 = smov [#allocation8]  }
  0x25   :  { %s43_s19 = sshll.u32 %s576_s18, 4  ;;  %s55_s22 = sshll.u32 %s577_s20, 4  ;;  %s44_s19 = int_to_ptr.vmem [resolvable:$true] %s43_s19  ;;  %s649_s22 = int_to_ptr.vmem [resolvable:$true] %s55_s22 }
  0x26   :  { %s498_s25 = scalar_lea.hbm %s733_s2, 1024 }
  0x27   :  { %p499_p2 = scmp.ne.s32.totalorder %s733_s2, %s498_s25  ;;  %p502_p3 = scmp.lt.u32.totalorder %s498_s25, %s733_s2 }
  0x29   :  { %p504_p4 = pnand %p502_p3, %p499_p2 }
  0x2b   :  { %507 = shalt.err (!%p504_p4)
}
  0x2c   :  { %s508_s0 = scalar_lea.vmem %s44_s19, 1024  ;;  %p513_p6 = scmp.lt.s32.totalorder %s44_s19, %s44_s19 }
  0x2d   :  { %p509_p5 = scmp.ne.s32.totalorder %s44_s19, %s508_s0  ;;  %p514_p7 = scmp.lt.s32.totalorder %s508_s0, %s508_s0 }
  0x2f   :  { %p515_p8 = por %p514_p7, %p513_p6 }
  0x31   :  { %p516_p9 = pnand %p515_p8, %p509_p5 }
  0x33   :  { %519 = shalt.err (!%p516_p9)
}
  0x34   :  { %49 = dma.hbm_to_vmem [thread:$0]  %s733_s2, 1024, %s44_s19, [#allocation6], %s574_s30, %s574_s30, %s575_s6  }
  0x35   :  { %s520_s10 = scalar_lea.hbm %s734_s3, 2048 }
  0x36   :  { %p521_p10 = scmp.ne.s32.totalorder %s734_s3, %s520_s10  ;;  %p524_p11 = scmp.lt.u32.totalorder %s520_s10, %s734_s3 }
  0x38   :  { %p526_p12 = pnand %p524_p11, %p521_p10 }
  0x3a   :  { %529 = shalt.err (!%p526_p12)
}
  0x3b   :  { %s530_s15 = scalar_lea.vmem %s649_s22, 2048  ;;  %p535_p0 = scmp.lt.s32.totalorder %s649_s22, %s649_s22 }
  0x3c   :  { %p531_p13 = scmp.ne.s32.totalorder %s649_s22, %s530_s15  ;;  %p536_p1 = scmp.lt.s32.totalorder %s530_s15, %s530_s15 }
  0x3e   :  { %p537_p2 = por %p536_p1, %p535_p0 }
  0x40   :  { %p538_p3 = pnand %p537_p2, %p531_p13 }
  0x42   :  { %541 = shalt.err (!%p538_p3)
}
  0x43   :  { %61 = dma.hbm_to_vmem [thread:$0]  %s734_s3, 2048, %s649_s22, [#allocation9], %s574_s30, %s574_s30, %s575_s6  }
  0x44   :  { %564 = dma.done.wait [#allocation3], 384  }
  0x45   :  { %565 = vsyncadd [#allocation3], 4294966912 }
  0x46   :  { %566 = dma.done.wait [#allocation6], 1408  }
  0x47   :  { %567 = vsyncadd [#allocation6], 4294965888 }
  0x48   :  { %568 = dma.done.wait [#allocation9], 2048  }
  0x49   :  { %569 = vsyncadd [#allocation9], 4294965248  ;;  %v578_v0 = vmov 0.0|0.0   ;;  %vm579_vm0 = vmmov 0   ;;  %v580_v1 = vmov 0.0   ;;  %v90_v2 = vld [vmem:[#allocation8] sm:$0xff] }
  0x4a   :  { %408 = vmatprep.subr.bf16.mxu0 %v578_v0  ;;  %432 = vmatprep.subr.bf16.mxu1 %v578_v0  ;;  %v91_v3 = vld [vmem:[#allocation8 + $0x8] sm:$0xff]  ;;  %v92_v4 = vld [vmem:[#allocation8 + $0x10] sm:$0xff]  ;;  %v93_v6 = vld [vmem:[#allocation8 + $0x18] sm:$0xff]  ;;  %vm186_vm1 = vcmask 523264   ;;  %s581_s17 = smov [#allocation10]  }
  0x4b   :  { %399 = vmatprep.mubr.msk.f32.mxu1 %vm579_vm0, %v580_v1  ;;  %374 = vmatprep.mubr.msk.f32.mxu0 %vm579_vm0, %v580_v1  ;;  %v409_v5 = vpack.c.bf16 %v91_v3, %v90_v2  ;;  %v79_v7 = vld [vmem:[#allocation7] sm:$0xff]  ;;  %v412_v8 = vpack.c.bf16 %v93_v6, %v92_v4  ;;  %v80_v10 = vld [vmem:[#allocation7 + $0x8] sm:$0xff]  ;;  %v81_v13 = vld [vmem:[#allocation7 + $0x10] sm:$0xff]  ;;  %s294_s18 = sshll.u32 %s581_s17, 4  ;;  %s295_s18 = int_to_ptr.vmem [resolvable:$true] %s294_s18 }
  0x4c   :  { %v94_v9 = vld [vmem:[#allocation8 + $0x20] sm:$0xff]  ;;  %v95_v11 = vld [vmem:[#allocation8 + $0x28] sm:$0xff]  ;;  %v433_v12 = vpack.c.bf16 %v80_v10, %v79_v7  ;;  %v82_v14 = vld [vmem:[#allocation7 + $0x18] sm:$0xff]  ;;  %s542_s19 = scalar_lea.vmem %s295_s18, 384  ;;  %p547_p5 = scmp.lt.s32.totalorder %s295_s18, %s295_s18 }
  0x4d   :  { %410 = vmatpush3.bf16.msra.mxu0 %v409_v5  ;;  %v436_v15 = vpack.c.bf16 %v82_v14, %v81_v13  ;;  %v415_v16 = vpack.c.bf16 %v95_v11, %v94_v9  ;;  %v83_v17 = vld [vmem:[#allocation7 + $0x20] sm:$0xff]  ;;  %v84_v18 = vld [vmem:[#allocation7 + $0x28] sm:$0xff]  ;;  %v96_v19 = vld [vmem:[#allocation8 + $0x30] sm:$0xff]  ;;  %p543_p4 = scmp.ne.s32.totalorder %s295_s18, %s542_s19  ;;  %p548_p6 = scmp.lt.s32.totalorder %s542_s19, %s542_s19 }
  0x4e   :  { %411 = vmatprep.subr.bf16.mxu0 %v578_v0  ;;  %434 = vmatpush3.bf16.msra.mxu1 %v433_v12  ;;  %v97_v20 = vld [vmem:[#allocation8 + $0x38] sm:$0xff]  ;;  %v439_v21 = vpack.c.bf16 %v84_v18, %v83_v17  ;;  %v85_v23 = vld [vmem:[#allocation7 + $0x30] sm:$0xff]  ;;  %v98_v25 = vld [vmem:[#allocation8 + $0x40] sm:$0xff] }
  0x4f   :  { %435 = vmatprep.subr.bf16.mxu1 %v578_v0  ;;  %v418_v22 = vpack.c.bf16 %v97_v20, %v96_v19  ;;  %v86_v24 = vld [vmem:[#allocation7 + $0x38] sm:$0xff]  ;;  %v99_v26 = vld [vmem:[#allocation8 + $0x48] sm:$0xff]  ;;  %v100_v29 = vld [vmem:[#allocation8 + $0x50] sm:$0xff]  ;;  %p549_p7 = por %p548_p6, %p547_p5 }
  0x50   :  { %v442_v27 = vpack.c.bf16 %v86_v24, %v85_v23  ;;  %v421_v28 = vpack.c.bf16 %v99_v26, %v98_v25  ;;  %v101_v30 = vld [vmem:[#allocation8 + $0x58] sm:$0xff]  ;;  %v76_v31 = vld [vmem:[#allocation2] sm:$0xff]  ;;  %v102_v33 = vld [vmem:[#allocation8 + $0x60] sm:$0xff] }
  0x51   :  { %413 = vmatpush3.bf16.msra.mxu0 %v412_v8  ;;  %v424_v32 = vpack.c.bf16 %v101_v30, %v100_v29  ;;  %v103_v34 = vld [vmem:[#allocation8 + $0x68] sm:$0xff]  ;;  %v77_v35 = vld [vmem:[#allocation2 + $0x8] sm:$0xff]  ;;  %v104_v37 = vld [vmem:[#allocation8 + $0x70] sm:$0xff]  ;;  %p550_p8 = pnand %p549_p7, %p543_p4 }
  0x52   :  { %414 = vmatprep.subr.bf16.mxu0 %v578_v0  ;;  %437 = vmatpush3.bf16.msra.mxu1 %v436_v15  ;;  %v427_v36 = vpack.c.bf16 %v103_v34, %v102_v33  ;;  %v105_v38 = vld [vmem:[#allocation8 + $0x78] sm:$0xff]  ;;  %v78_v39 = vld [vmem:[#allocation2 + $0x10] sm:$0xff]  ;;  %v87_v41 = vld [vmem:[#allocation5] sm:$0xff] }
  0x53   :  { %438 = vmatprep.subr.bf16.mxu1 %v578_v0  ;;  %v430_v40 = vpack.c.bf16 %v105_v38, %v104_v37  ;;  %v88_v42 = vld [vmem:[#allocation5 + $0x8] sm:$0xff]  ;;  %v89_v43 = vld [vmem:[#allocation5 + $0x10] sm:$0xff] }
  0x54   :  { %v311_v51 = vld [vmem:[%s735_s4] ss:$0 sm:$0xff] }
  0x55   :  { %416 = vmatpush3.bf16.msra.mxu0 %v415_v16 }
  0x56   :  { %417 = vmatprep.subr.bf16.mxu0 %v578_v0  ;;  %440 = vmatpush3.bf16.msra.mxu1 %v439_v21 }
  0x57   :  { %441 = vmatprep.subr.bf16.mxu1 %v578_v0 }
  0x59   :  { %419 = vmatpush3.bf16.msra.mxu0 %v418_v22 }
  0x5a   :  { %420 = vmatprep.subr.bf16.mxu0 %v578_v0  ;;  %443 = vmatpush3.bf16.msra.mxu1 %v442_v27 }
  0x5d   :  { %422 = vmatpush3.bf16.msra.mxu0 %v421_v28  ;;  %400 = vmatmul.mubr.msk.f32.vlgmr.msra.gmra.mrb[0].mxu1 %vm186_vm1, %v76_v31 }
  0x5e   :  { %423 = vmatprep.subr.bf16.mxu0 %v578_v0  ;;  %402 = vmatprep.mubr.msk.f32.mxu1 %vm579_vm0, %v580_v1 }
  0x61   :  { %425 = vmatpush3.bf16.msra.mxu0 %v424_v32  ;;  %403 = vmatmul.mubr.msk.f32.gmra.mrb[2].mxu1 %vm186_vm1, %v77_v35 }
  0x62   :  { %426 = vmatprep.subr.bf16.mxu0 %v578_v0  ;;  %405 = vmatprep.mubr.msk.f32.mxu1 %vm579_vm0, %v580_v1 }
  0x65   :  { %428 = vmatpush3.bf16.msra.mxu0 %v427_v36  ;;  %406 = vmatmul.mubr.msk.f32.gmra.mrb[4].mxu1 %vm186_vm1, %v78_v39 }
  0x66   :  { %429 = vmatprep.subr.bf16.mxu0 %v578_v0 }
  0x69   :  { %431 = vmatpush3.bf16.msra.mxu0 %v430_v40 }
  0x6c   :  { %375 = vmatmul.mubr.f32.vlgmr.msra.gmra.mrb[0].mxu0 %v87_v41 }
  0x6d   :  { %377 = vmatprep.mubr.msk.f32.mxu0 %vm579_vm0, %v580_v1 }
  0x70   :  { %378 = vmatmul.mubr.f32.gmra.mrb[2].mxu0 %v88_v42 }
  0x71   :  { %380 = vmatprep.mubr.msk.f32.mxu0 %vm579_vm0, %v580_v1 }
  0x74   :  { %381 = vmatmul.mubr.f32.gmra.mrb[4].mxu0 %v89_v43 }
 0x130   :  { %v262_v44 = vpop.f32.mrb[0].mxu1 }
 0x131   :  { %v401_v45 = vpop.f32.mrb[1].mxu1 }
 0x134   :  { %v267_v46 = vpop.f32.mrb[2].mxu1 }
 0x135   :  { %v404_v47 = vpop.f32.mrb[3].mxu1 }
 0x138   :  { %v272_v48 = vpop.f32.mrb[4].mxu1 }
 0x139   :  { %v407_v49 = vpop.f32.mrb[5].mxu1 }
 0x13f   :  { %v172_v50 = vpop.f32.mrb[0].mxu0 }
 0x140   :  { %v263_v52 = vadd.f32 %v262_v44, %v172_v50  ;;  %v376_v53 = vpop.f32.mrb[1].mxu0 }
 0x142   :  { %v283_v54 = vadd.f32 %v311_v51, %v263_v52 }
 0x143   :  { %v177_v55 = vpop.f32.mrb[2].mxu0 }
 0x144   :  { %286 = vst [vmem:[#allocation10] sm:$0xff] %v283_v54  ;;  %v268_v56 = vadd.f32 %v267_v46, %v177_v55  ;;  %v379_v57 = vpop.f32.mrb[3].mxu0 }
 0x146   :  { %v284_v58 = vadd.f32 %v311_v51, %v268_v56 }
 0x147   :  { %v182_v59 = vpop.f32.mrb[4].mxu0 }
 0x148   :  { %287 = vst [vmem:[#allocation10 + $0x8] sm:$0xff] %v284_v58  ;;  %v273_v60 = vadd.f32 %v272_v48, %v182_v59  ;;  %v382_v61 = vpop.f32.mrb[5].mxu0 }
 0x14a   :  { %v285_v62 = vadd.f32 %v311_v51, %v273_v60 }
 0x14c   :  { %288 = vst [vmem:[#allocation10 + $0x10] sm:$0xff] %v285_v62 }
 0x14d   :  { %553 = shalt.err (!%p550_p8)
}
 0x14e   :  { %s554_s22 = scalar_lea.hbm %s736_s5, 384 }
 0x14f   :  { %p555_p9 = scmp.ne.s32.totalorder %s736_s5, %s554_s22  ;;  %p558_p10 = scmp.lt.u32.totalorder %s554_s22, %s736_s5 }
 0x151   :  { %p560_p11 = pnand %p558_p10, %p555_p9 }
 0x153   :  { %563 = shalt.err (!%p560_p11)
}
 0x154   :  { %300 = dma.vmem_to_hbm [thread:$0]  %s295_s18, 384, %s736_s5, [#allocation4], %s574_s30, %s574_s30, %s575_s6  }
 0x155   :  { %570 = dma.done.wait [#allocation4], 384  }
 0x156   :  { %571 = vsyncadd [#allocation4], 4294966912 }
 0x157   :  { %304 = vsyncpa [#allocation3], 1 }
 0x158   :  { %305 = vsyncpa [#allocation6], 1 }
 0x159   :  { %306 = vsyncpa [#allocation9], 1 }
 0x15a   :  { %307 = vsyncpa [#allocation4], 1 }

</bundles_post_ra>
